<compile_context>
chip_gen: v6e
topology: v6e:2x2x1
jax: 0.10.0
libtpu: 0.0.40
codegen_flags: <defaults>
</compile_context>

<pallas_src>
import math

import jax
import jax.numpy as jnp
from jax.experimental import pallas as pl
from jax.experimental.pallas import tpu as pltpu

EPS = 1e-5     # nn.BatchNorm1d default eps
LANE = 128     # lane-dense output slab width


# ---------------------------------------------------------------------------
# Fused kernel: entire UltraResNet forward (eval mode, BN pre-folded)
# ---------------------------------------------------------------------------
def _fused_kernel(x_ref, w_in_ref, b_in_ref,
                  wb1_ref, wb2_ref, bb_ref,
                  wh1_ref, bh1_ref, wh2_ref, bh2_ref, wh3_ref, bh3_ref,
                  o_ref):
    f32 = jnp.float32
    bf16 = jnp.bfloat16

    # input layer: Linear(+folded BN) -> ReLU       (Dropout(0.3) = identity)
    h = jnp.maximum(
        jnp.dot(x_ref[...].astype(bf16), w_in_ref[...],
                preferred_element_type=f32) + b_in_ref[...], 0.0)

    # residual blocks (static unroll; weights stacked on a leading block axis)
    # TODO(synk): if num_blocks grows beyond ~8, switch to lax.fori_loop with a
    # dynamic first-axis index on wb1_ref/wb2_ref/bb_ref to bound code size.
    num_blocks = wb1_ref.shape[0]
    for i in range(num_blocks):
        bb = bb_ref[i]                                       # (2, H) f32
        t = jnp.maximum(
            jnp.dot(h.astype(bf16), wb1_ref[i],
                    preferred_element_type=f32) + bb[0:1, :], 0.0)
        t = (jnp.dot(t.astype(bf16), wb2_ref[i],
                     preferred_element_type=f32) + bb[1:2, :])
        h = jnp.maximum(t + h, 0.0)                # residual add stays f32

    # output head: Linear(+BN) -> ReLU -> Linear -> ReLU -> Linear(64 -> 1)
    t = jnp.maximum(
        jnp.dot(h.astype(bf16), wh1_ref[...],
                preferred_element_type=f32) + bh1_ref[...], 0.0)
    t = jnp.maximum(
        jnp.dot(t.astype(bf16), wh2_ref[...],
                preferred_element_type=f32) + bh2_ref[...], 0.0)
    # final 64 -> 1 projection as VPU multiply + lane reduction (XLU, ~free),
    # lane-broadcast into the lane-dense (B, 128) output slab.
    y = jnp.sum(t * wh3_ref[...], axis=-1, keepdims=True) + bh3_ref[...]
    o_ref[...] = jnp.broadcast_to(y, o_ref.shape)


def ultra_resnet_forward(x, fused_params):
    """x: (B, input_size) f32. Returns (B,) like PyTorch `.squeeze()`."""
    B = x.shape[0]
    args = (x.astype(jnp.float32),) + tuple(fused_params)
    vmem = lambda: pl.BlockSpec(memory_space=pltpu.MemorySpace.VMEM)
    out = pl.pallas_call(
        _fused_kernel,
        out_shape=jax.ShapeDtypeStruct((B, LANE), jnp.float32),
        in_specs=[vmem() for _ in args],
        out_specs=vmem(),
    )(*args)
    # TODO(synk): for large batch on v7x, add a leading batch grid axis with
    # dimension_semantics=("parallel",) (weights on constant index_maps stay
    # VMEM-resident); size the batch tile for v7x's 64 MiB VMEM / 32 MiB
    # default scoped limit. Unnecessary at these sizes on v5e/v6e (1 TC).
    return out[:, 0]


# ---------------------------------------------------------------------------
# Deterministic parameter initialization (shapes follow the PyTorch module)
# ---------------------------------------------------------------------------
def _linear_params(key, fan_in, fan_out):
    k_w, k_b = jax.random.split(key)
    bound = 1.0 / math.sqrt(fan_in)
    w = jax.random.uniform(k_w, (fan_in, fan_out), jnp.float32, -bound, bound)
    b = jax.random.uniform(k_b, (1, fan_out), jnp.float32, -bound, bound)
    return w, b


def _bn_params(key, n):
    k1, k2, k3, k4 = jax.random.split(key, 4)
    gamma = 1.0 + 0.1 * jax.random.normal(k1, (1, n), jnp.float32)
    beta = 0.1 * jax.random.normal(k2, (1, n), jnp.float32)
    running_mean = 0.1 * jax.random.normal(k3, (1, n), jnp.float32)
    running_var = jax.random.uniform(k4, (1, n), jnp.float32, 0.5, 1.5)
    return gamma, beta, running_mean, running_var


def init_params(key, input_size, hidden_size=32, num_blocks=4):
    k_in, k_blk, k_head = jax.random.split(key, 3)

    params = {"hidden": hidden_size, "num_blocks": num_blocks}

    k1, k2 = jax.random.split(k_in)
    params["input"] = {"lin": _linear_params(k1, input_size, hidden_size),
                       "bn": _bn_params(k2, hidden_size)}

    blocks = []
    for kb in jax.random.split(k_blk, num_blocks):
        ka, kabn, kc, kcbn = jax.random.split(kb, 4)
        blocks.append({"lin1": _linear_params(ka, hidden_size, hidden_size),
                       "bn1": _bn_params(kabn, hidden_size),
                       "lin2": _linear_params(kc, hidden_size, hidden_size),
                       "bn2": _bn_params(kcbn, hidden_size)})
    params["blocks"] = blocks

    kh1, kh1bn, kh2, kh3 = jax.random.split(k_head, 4)
    params["head"] = {"lin1": _linear_params(kh1, hidden_size, 128),
                      "bn1": _bn_params(kh1bn, 128),
                      "lin2": _linear_params(kh2, 128, 64),
                      "lin3": _linear_params(kh3, 64, 1)}
    return params


# ---------------------------------------------------------------------------
# Fold eval-mode BN into the preceding Linear; real shapes; bf16 weights.
# ---------------------------------------------------------------------------
def _fold_bn(w, b, gamma, beta, mean, var):
    scale = gamma * jax.lax.rsqrt(var + EPS)        # (1, n)
    return w * scale, (b - mean) * scale + beta


def prepare_fused_params(params):
    bf16 = jnp.bfloat16

    # input layer: (input_size, hidden) bf16 weight, (1, hidden) f32 bias
    w, b = _fold_bn(*params["input"]["lin"], *params["input"]["bn"])
    w_in, b_in = w.astype(bf16), b

    # residual blocks -> stacked (nb, H, H) bf16 weights, (nb, 2, H) f32 biases
    w1s, w2s, bbs = [], [], []
    for blk in params["blocks"]:
        w1, b1 = _fold_bn(*blk["lin1"], *blk["bn1"])
        w2, b2 = _fold_bn(*blk["lin2"], *blk["bn2"])
        w1s.append(w1.astype(bf16))
        w2s.append(w2.astype(bf16))
        bbs.append(jnp.concatenate([b1, b2], axis=0))
    wb1, wb2, bb = jnp.stack(w1s), jnp.stack(w2s), jnp.stack(bbs)

    # head: (H,128) & (128,64) bf16 matmuls, final 64->1 as a (1,64) f32 row
    head = params["head"]
    wh1, bh1 = _fold_bn(*head["lin1"], *head["bn1"])
    wh1 = wh1.astype(bf16)
    wh2, bh2 = head["lin2"][0].astype(bf16), head["lin2"][1]
    wh3 = head["lin3"][0].T                       # (1, 64) f32
    bh3 = head["lin3"][1]                         # (1, 1)  f32

    return (w_in, b_in, wb1, wb2, bb, wh1, bh1, wh2, bh2, wh3, bh3)


# ---------------------------------------------------------------------------
# References: (a) exact math of the fused kernel (bf16 weights, f32 acc) and
# (b) original-semantics pure-f32 model, for a two-tier correctness check.
# ---------------------------------------------------------------------------
def _reference_fused(x, fused):
    (w_in, b_in, wb1, wb2, bb, wh1, bh1, wh2, bh2, wh3, bh3) = fused
    f32, bf16 = jnp.float32, jnp.bfloat16
    h = jnp.maximum(
        jnp.dot(x.astype(bf16), w_in, preferred_element_type=f32) + b_in, 0.0)
    for i in range(wb1.shape[0]):
        t = jnp.maximum(
            jnp.dot(h.astype(bf16), wb1[i], preferred_element_type=f32)
            + bb[i, 0:1], 0.0)
        t = (jnp.dot(t.astype(bf16), wb2[i], preferred_element_type=f32)
             + bb[i, 1:2])
        h = jnp.maximum(t + h, 0.0)
    t = jnp.maximum(
        jnp.dot(h.astype(bf16), wh1, preferred_element_type=f32) + bh1, 0.0)
    t = jnp.maximum(
        jnp.dot(t.astype(bf16), wh2, preferred_element_type=f32) + bh2, 0.0)
    return jnp.squeeze(jnp.sum(t * wh3, axis=-1, keepdims=True) + bh3, axis=-1)


def _reference_forward(x, params):
    def bn(y, g, b, mu, var):
        return (y - mu) * (g * jax.lax.rsqrt(var + EPS)) + b

    w, b = params["input"]["lin"]
    g, be, mu, var = params["input"]["bn"]
    h = jnp.maximum(bn(x @ w + b, g, be, mu, var), 0.0)

    for blk in params["blocks"]:
        w1, b1 = blk["lin1"]; g1, be1, mu1, v1 = blk["bn1"]
        w2, b2 = blk["lin2"]; g2, be2, mu2, v2 = blk["bn2"]
        t = jnp.maximum(bn(h @ w1 + b1, g1, be1, mu1, v1), 0.0)
        t = bn(t @ w2 + b2, g2, be2, mu2, v2)
        h = jnp.maximum(t + h, 0.0)

    head = params["head"]
    w1, b1 = head["lin1"]; g, be, mu, var = head["bn1"]
    t = jnp.maximum(bn(h @ w1 + b1, g, be, mu, var), 0.0)
    w2, b2 = head["lin2"]
    t = jnp.maximum(t @ w2 + b2, 0.0)
    w3, b3 = head["lin3"]
    return jnp.squeeze(t @ w3 + b3)


if __name__ == "__main__":
    B, INPUT_SIZE, HIDDEN, NUM_BLOCKS = 8, 16, 32, 4

    key = jax.random.PRNGKey(0)
    k_x, k_p = jax.random.split(key)
    x = jax.random.normal(k_x, (B, INPUT_SIZE), jnp.float32)

    params = init_params(k_p, INPUT_SIZE, HIDDEN, NUM_BLOCKS)
    fused = prepare_fused_params(params)

    y = ultra_resnet_forward(x, fused)
    y = jax.block_until_ready(y)

    assert y.shape == (B,), y.shape
    assert bool(jnp.all(jnp.isfinite(y)))

    # strict: kernel must match the same bf16-weight / f32-accumulate math
    y_fused = _reference_fused(x, fused)
    assert bool(jnp.allclose(y, y_fused, rtol=1e-3, atol=1e-3)), (y, y_fused)

    # loose: matches the original full-f32 module semantics (bf16 weight quant)
    y_ref = _reference_forward(x, params)
    assert bool(jnp.allclose(y, y_ref, rtol=1e-1, atol=1e-1)), (y, y_ref)

    print("KERNEL_OK")
</pallas_src>

<mosaic_0001>
module attributes {stable_mosaic.version = 11 : i64} {
  func.func @_fused_kernel(%arg0: memref<8x16xf32, #tpu.memory_space<vmem>>, %arg1: memref<16x32xbf16, #tpu.memory_space<vmem>>, %arg2: memref<1x32xf32, #tpu.memory_space<vmem>>, %arg3: memref<4x32x32xbf16, #tpu.memory_space<vmem>>, %arg4: memref<4x32x32xbf16, #tpu.memory_space<vmem>>, %arg5: memref<4x2x32xf32, #tpu.memory_space<vmem>>, %arg6: memref<32x128xbf16, #tpu.memory_space<vmem>>, %arg7: memref<1x128xf32, #tpu.memory_space<vmem>>, %arg8: memref<128x64xbf16, #tpu.memory_space<vmem>>, %arg9: memref<1x64xf32, #tpu.memory_space<vmem>>, %arg10: memref<1x64xf32, #tpu.memory_space<vmem>>, %arg11: memref<1x1xf32, #tpu.memory_space<vmem>>, %arg12: memref<8x128xf32, #tpu.memory_space<vmem>>) attributes {dimension_semantics = [], scalar_prefetch = 0 : i64, scratch_operands = 0 : i64, tpu.core_type = #tpu.core_type<tc>} {
    %c0 = arith.constant 0 : index
    %c0_0 = arith.constant 0 : index
    %0 = vector.load %arg0[%c0, %c0_0] : memref<8x16xf32, #tpu.memory_space<vmem>>, vector<8x16xf32>
    %1 = arith.truncf %0 : vector<8x16xf32> to vector<8x16xbf16>
    %c0_1 = arith.constant 0 : index
    %c0_2 = arith.constant 0 : index
    %2 = vector.load %arg1[%c0_1, %c0_2] : memref<16x32xbf16, #tpu.memory_space<vmem>>, vector<16x32xbf16>
    %cst = arith.constant dense<0.000000e+00> : vector<8x32xf32>
    %3 = tpu.matmul %1, %2, %cst {dimension_numbers = #tpu.dot_dimension_numbers<[1], [0], [0], [1], [0, 0, 1, 1], [], []>} : vector<8x16xbf16>, vector<16x32xbf16>, vector<8x32xf32> -> vector<8x32xf32>
    %c0_3 = arith.constant 0 : index
    %c0_4 = arith.constant 0 : index
    %4 = vector.load %arg2[%c0_3, %c0_4] : memref<1x32xf32, #tpu.memory_space<vmem>>, vector<1x32xf32>
    %5 = vector.broadcast %4 : vector<1x32xf32> to vector<8x32xf32>
    %6 = arith.addf %3, %5 : vector<8x32xf32>
    %cst_5 = arith.constant 0.000000e+00 : f32
    %7 = vector.broadcast %cst_5 : f32 to vector<8x32xf32>
    %8 = arith.maximumf %6, %7 : vector<8x32xf32>
    %c0_6 = arith.constant 0 : index
    %c0_7 = arith.constant 0 : index
    %c0_8 = arith.constant 0 : index
    %9 = vector.load %arg5[%c0_6, %c0_7, %c0_8] : memref<4x2x32xf32, #tpu.memory_space<vmem>>, vector<1x2x32xf32>
    %10 = vector.shape_cast %9 : vector<1x2x32xf32> to vector<2x32xf32>
    %11 = arith.truncf %8 : vector<8x32xf32> to vector<8x32xbf16>
    %c0_9 = arith.constant 0 : index
    %c0_10 = arith.constant 0 : index
    %c0_11 = arith.constant 0 : index
    %12 = vector.load %arg3[%c0_9, %c0_10, %c0_11] : memref<4x32x32xbf16, #tpu.memory_space<vmem>>, vector<1x32x32xbf16>
    %13 = vector.shape_cast %12 : vector<1x32x32xbf16> to vector<32x32xbf16>
    %cst_12 = arith.constant dense<0.000000e+00> : vector<8x32xf32>
    %14 = tpu.matmul %11, %13, %cst_12 {dimension_numbers = #tpu.dot_dimension_numbers<[1], [0], [0], [1], [0, 0, 1, 1], [], []>} : vector<8x32xbf16>, vector<32x32xbf16>, vector<8x32xf32> -> vector<8x32xf32>
    %15 = vector.extract_strided_slice %10 {offsets = [0, 0], sizes = [1, 32], strides = [1, 1]} : vector<2x32xf32> to vector<1x32xf32>
    %16 = vector.broadcast %15 : vector<1x32xf32> to vector<8x32xf32>
    %17 = arith.addf %14, %16 : vector<8x32xf32>
    %cst_13 = arith.constant 0.000000e+00 : f32
    %18 = vector.broadcast %cst_13 : f32 to vector<8x32xf32>
    %19 = arith.maximumf %17, %18 : vector<8x32xf32>
    %20 = arith.truncf %19 : vector<8x32xf32> to vector<8x32xbf16>
    %c0_14 = arith.constant 0 : index
    %c0_15 = arith.constant 0 : index
    %c0_16 = arith.constant 0 : index
    %21 = vector.load %arg4[%c0_14, %c0_15, %c0_16] : memref<4x32x32xbf16, #tpu.memory_space<vmem>>, vector<1x32x32xbf16>
    %22 = vector.shape_cast %21 : vector<1x32x32xbf16> to vector<32x32xbf16>
    %cst_17 = arith.constant dense<0.000000e+00> : vector<8x32xf32>
    %23 = tpu.matmul %20, %22, %cst_17 {dimension_numbers = #tpu.dot_dimension_numbers<[1], [0], [0], [1], [0, 0, 1, 1], [], []>} : vector<8x32xbf16>, vector<32x32xbf16>, vector<8x32xf32> -> vector<8x32xf32>
    %24 = vector.extract_strided_slice %10 {offsets = [1, 0], sizes = [1, 32], strides = [1, 1]} : vector<2x32xf32> to vector<1x32xf32>
    %25 = vector.broadcast %24 : vector<1x32xf32> to vector<8x32xf32>
    %26 = arith.addf %23, %25 : vector<8x32xf32>
    %27 = arith.addf %26, %8 : vector<8x32xf32>
    %cst_18 = arith.constant 0.000000e+00 : f32
    %28 = vector.broadcast %cst_18 : f32 to vector<8x32xf32>
    %29 = arith.maximumf %27, %28 : vector<8x32xf32>
    %c1 = arith.constant 1 : index
    %c0_19 = arith.constant 0 : index
    %c0_20 = arith.constant 0 : index
    %30 = vector.load %arg5[%c1, %c0_19, %c0_20] : memref<4x2x32xf32, #tpu.memory_space<vmem>>, vector<1x2x32xf32>
    %31 = vector.shape_cast %30 : vector<1x2x32xf32> to vector<2x32xf32>
    %32 = arith.truncf %29 : vector<8x32xf32> to vector<8x32xbf16>
    %c1_21 = arith.constant 1 : index
    %c0_22 = arith.constant 0 : index
    %c0_23 = arith.constant 0 : index
    %33 = vector.load %arg3[%c1_21, %c0_22, %c0_23] : memref<4x32x32xbf16, #tpu.memory_space<vmem>>, vector<1x32x32xbf16>
    %34 = vector.shape_cast %33 : vector<1x32x32xbf16> to vector<32x32xbf16>
    %cst_24 = arith.constant dense<0.000000e+00> : vector<8x32xf32>
    %35 = tpu.matmul %32, %34, %cst_24 {dimension_numbers = #tpu.dot_dimension_numbers<[1], [0], [0], [1], [0, 0, 1, 1], [], []>} : vector<8x32xbf16>, vector<32x32xbf16>, vector<8x32xf32> -> vector<8x32xf32>
    %36 = vector.extract_strided_slice %31 {offsets = [0, 0], sizes = [1, 32], strides = [1, 1]} : vector<2x32xf32> to vector<1x32xf32>
    %37 = vector.broadcast %36 : vector<1x32xf32> to vector<8x32xf32>
    %38 = arith.addf %35, %37 : vector<8x32xf32>
    %cst_25 = arith.constant 0.000000e+00 : f32
    %39 = vector.broadcast %cst_25 : f32 to vector<8x32xf32>
    %40 = arith.maximumf %38, %39 : vector<8x32xf32>
    %41 = arith.truncf %40 : vector<8x32xf32> to vector<8x32xbf16>
    %c1_26 = arith.constant 1 : index
    %c0_27 = arith.constant 0 : index
    %c0_28 = arith.constant 0 : index
    %42 = vector.load %arg4[%c1_26, %c0_27, %c0_28] : memref<4x32x32xbf16, #tpu.memory_space<vmem>>, vector<1x32x32xbf16>
    %43 = vector.shape_cast %42 : vector<1x32x32xbf16> to vector<32x32xbf16>
    %cst_29 = arith.constant dense<0.000000e+00> : vector<8x32xf32>
    %44 = tpu.matmul %41, %43, %cst_29 {dimension_numbers = #tpu.dot_dimension_numbers<[1], [0], [0], [1], [0, 0, 1, 1], [], []>} : vector<8x32xbf16>, vector<32x32xbf16>, vector<8x32xf32> -> vector<8x32xf32>
    %45 = vector.extract_strided_slice %31 {offsets = [1, 0], sizes = [1, 32], strides = [1, 1]} : vector<2x32xf32> to vector<1x32xf32>
    %46 = vector.broadcast %45 : vector<1x32xf32> to vector<8x32xf32>
    %47 = arith.addf %44, %46 : vector<8x32xf32>
    %48 = arith.addf %47, %29 : vector<8x32xf32>
    %cst_30 = arith.constant 0.000000e+00 : f32
    %49 = vector.broadcast %cst_30 : f32 to vector<8x32xf32>
    %50 = arith.maximumf %48, %49 : vector<8x32xf32>
    %c2 = arith.constant 2 : index
    %c0_31 = arith.constant 0 : index
    %c0_32 = arith.constant 0 : index
    %51 = vector.load %arg5[%c2, %c0_31, %c0_32] : memref<4x2x32xf32, #tpu.memory_space<vmem>>, vector<1x2x32xf32>
    %52 = vector.shape_cast %51 : vector<1x2x32xf32> to vector<2x32xf32>
    %53 = arith.truncf %50 : vector<8x32xf32> to vector<8x32xbf16>
    %c2_33 = arith.constant 2 : index
    %c0_34 = arith.constant 0 : index
    %c0_35 = arith.constant 0 : index
    %54 = vector.load %arg3[%c2_33, %c0_34, %c0_35] : memref<4x32x32xbf16, #tpu.memory_space<vmem>>, vector<1x32x32xbf16>
    %55 = vector.shape_cast %54 : vector<1x32x32xbf16> to vector<32x32xbf16>
    %cst_36 = arith.constant dense<0.000000e+00> : vector<8x32xf32>
    %56 = tpu.matmul %53, %55, %cst_36 {dimension_numbers = #tpu.dot_dimension_numbers<[1], [0], [0], [1], [0, 0, 1, 1], [], []>} : vector<8x32xbf16>, vector<32x32xbf16>, vector<8x32xf32> -> vector<8x32xf32>
    %57 = vector.extract_strided_slice %52 {offsets = [0, 0], sizes = [1, 32], strides = [1, 1]} : vector<2x32xf32> to vector<1x32xf32>
    %58 = vector.broadcast %57 : vector<1x32xf32> to vector<8x32xf32>
    %59 = arith.addf %56, %58 : vector<8x32xf32>
    %cst_37 = arith.constant 0.000000e+00 : f32
    %60 = vector.broadcast %cst_37 : f32 to vector<8x32xf32>
    %61 = arith.maximumf %59, %60 : vector<8x32xf32>
    %62 = arith.truncf %61 : vector<8x32xf32> to vector<8x32xbf16>
    %c2_38 = arith.constant 2 : index
    %c0_39 = arith.constant 0 : index
    %c0_40 = arith.constant 0 : index
    %63 = vector.load %arg4[%c2_38, %c0_39, %c0_40] : memref<4x32x32xbf16, #tpu.memory_space<vmem>>, vector<1x32x32xbf16>
    %64 = vector.shape_cast %63 : vector<1x32x32xbf16> to vector<32x32xbf16>
    %cst_41 = arith.constant dense<0.000000e+00> : vector<8x32xf32>
    %65 = tpu.matmul %62, %64, %cst_41 {dimension_numbers = #tpu.dot_dimension_numbers<[1], [0], [0], [1], [0, 0, 1, 1], [], []>} : vector<8x32xbf16>, vector<32x32xbf16>, vector<8x32xf32> -> vector<8x32xf32>
    %66 = vector.extract_strided_slice %52 {offsets = [1, 0], sizes = [1, 32], strides = [1, 1]} : vector<2x32xf32> to vector<1x32xf32>
    %67 = vector.broadcast %66 : vector<1x32xf32> to vector<8x32xf32>
    %68 = arith.addf %65, %67 : vector<8x32xf32>
    %69 = arith.addf %68, %50 : vector<8x32xf32>
    %cst_42 = arith.constant 0.000000e+00 : f32
    %70 = vector.broadcast %cst_42 : f32 to vector<8x32xf32>
    %71 = arith.maximumf %69, %70 : vector<8x32xf32>
    %c3 = arith.constant 3 : index
    %c0_43 = arith.constant 0 : index
    %c0_44 = arith.constant 0 : index
    %72 = vector.load %arg5[%c3, %c0_43, %c0_44] : memref<4x2x32xf32, #tpu.memory_space<vmem>>, vector<1x2x32xf32>
    %73 = vector.shape_cast %72 : vector<1x2x32xf32> to vector<2x32xf32>
    %74 = arith.truncf %71 : vector<8x32xf32> to vector<8x32xbf16>
    %c3_45 = arith.constant 3 : index
    %c0_46 = arith.constant 0 : index
    %c0_47 = arith.constant 0 : index
    %75 = vector.load %arg3[%c3_45, %c0_46, %c0_47] : memref<4x32x32xbf16, #tpu.memory_space<vmem>>, vector<1x32x32xbf16>
    %76 = vector.shape_cast %75 : vector<1x32x32xbf16> to vector<32x32xbf16>
    %cst_48 = arith.constant dense<0.000000e+00> : vector<8x32xf32>
    %77 = tpu.matmul %74, %76, %cst_48 {dimension_numbers = #tpu.dot_dimension_numbers<[1], [0], [0], [1], [0, 0, 1, 1], [], []>} : vector<8x32xbf16>, vector<32x32xbf16>, vector<8x32xf32> -> vector<8x32xf32>
    %78 = vector.extract_strided_slice %73 {offsets = [0, 0], sizes = [1, 32], strides = [1, 1]} : vector<2x32xf32> to vector<1x32xf32>
    %79 = vector.broadcast %78 : vector<1x32xf32> to vector<8x32xf32>
    %80 = arith.addf %77, %79 : vector<8x32xf32>
    %cst_49 = arith.constant 0.000000e+00 : f32
    %81 = vector.broadcast %cst_49 : f32 to vector<8x32xf32>
    %82 = arith.maximumf %80, %81 : vector<8x32xf32>
    %83 = arith.truncf %82 : vector<8x32xf32> to vector<8x32xbf16>
    %c3_50 = arith.constant 3 : index
    %c0_51 = arith.constant 0 : index
    %c0_52 = arith.constant 0 : index
    %84 = vector.load %arg4[%c3_50, %c0_51, %c0_52] : memref<4x32x32xbf16, #tpu.memory_space<vmem>>, vector<1x32x32xbf16>
    %85 = vector.shape_cast %84 : vector<1x32x32xbf16> to vector<32x32xbf16>
    %cst_53 = arith.constant dense<0.000000e+00> : vector<8x32xf32>
    %86 = tpu.matmul %83, %85, %cst_53 {dimension_numbers = #tpu.dot_dimension_numbers<[1], [0], [0], [1], [0, 0, 1, 1], [], []>} : vector<8x32xbf16>, vector<32x32xbf16>, vector<8x32xf32> -> vector<8x32xf32>
    %87 = vector.extract_strided_slice %73 {offsets = [1, 0], sizes = [1, 32], strides = [1, 1]} : vector<2x32xf32> to vector<1x32xf32>
    %88 = vector.broadcast %87 : vector<1x32xf32> to vector<8x32xf32>
    %89 = arith.addf %86, %88 : vector<8x32xf32>
    %90 = arith.addf %89, %71 : vector<8x32xf32>
    %cst_54 = arith.constant 0.000000e+00 : f32
    %91 = vector.broadcast %cst_54 : f32 to vector<8x32xf32>
    %92 = arith.maximumf %90, %91 : vector<8x32xf32>
    %93 = arith.truncf %92 : vector<8x32xf32> to vector<8x32xbf16>
    %c0_55 = arith.constant 0 : index
    %c0_56 = arith.constant 0 : index
    %94 = vector.load %arg6[%c0_55, %c0_56] : memref<32x128xbf16, #tpu.memory_space<vmem>>, vector<32x128xbf16>
    %cst_57 = arith.constant dense<0.000000e+00> : vector<8x128xf32>
    %95 = tpu.matmul %93, %94, %cst_57 {dimension_numbers = #tpu.dot_dimension_numbers<[1], [0], [0], [1], [0, 0, 1, 1], [], []>} : vector<8x32xbf16>, vector<32x128xbf16>, vector<8x128xf32> -> vector<8x128xf32>
    %c0_58 = arith.constant 0 : index
    %c0_59 = arith.constant 0 : index
    %96 = vector.load %arg7[%c0_58, %c0_59] : memref<1x128xf32, #tpu.memory_space<vmem>>, vector<1x128xf32>
    %97 = vector.broadcast %96 : vector<1x128xf32> to vector<8x128xf32>
    %98 = arith.addf %95, %97 : vector<8x128xf32>
    %cst_60 = arith.constant 0.000000e+00 : f32
    %99 = vector.broadcast %cst_60 : f32 to vector<8x128xf32>
    %100 = arith.maximumf %98, %99 : vector<8x128xf32>
    %101 = arith.truncf %100 : vector<8x128xf32> to vector<8x128xbf16>
    %c0_61 = arith.constant 0 : index
    %c0_62 = arith.constant 0 : index
    %102 = vector.load %arg8[%c0_61, %c0_62] : memref<128x64xbf16, #tpu.memory_space<vmem>>, vector<128x64xbf16>
    %cst_63 = arith.constant dense<0.000000e+00> : vector<8x64xf32>
    %103 = tpu.matmul %101, %102, %cst_63 {dimension_numbers = #tpu.dot_dimension_numbers<[1], [0], [0], [1], [0, 0, 1, 1], [], []>} : vector<8x128xbf16>, vector<128x64xbf16>, vector<8x64xf32> -> vector<8x64xf32>
    %c0_64 = arith.constant 0 : index
    %c0_65 = arith.constant 0 : index
    %104 = vector.load %arg9[%c0_64, %c0_65] : memref<1x64xf32, #tpu.memory_space<vmem>>, vector<1x64xf32>
    %105 = vector.broadcast %104 : vector<1x64xf32> to vector<8x64xf32>
    %106 = arith.addf %103, %105 : vector<8x64xf32>
    %cst_66 = arith.constant 0.000000e+00 : f32
    %107 = vector.broadcast %cst_66 : f32 to vector<8x64xf32>
    %108 = arith.maximumf %106, %107 : vector<8x64xf32>
    %c0_67 = arith.constant 0 : index
    %c0_68 = arith.constant 0 : index
    %109 = vector.load %arg10[%c0_67, %c0_68] : memref<1x64xf32, #tpu.memory_space<vmem>>, vector<1x64xf32>
    %110 = vector.broadcast %109 : vector<1x64xf32> to vector<8x64xf32>
    %111 = arith.mulf %108, %110 : vector<8x64xf32>
    %cst_69 = arith.constant dense<0.000000e+00> : vector<8xf32>
    %112 = vector.multi_reduction <add>, %111, %cst_69 [1] : vector<8x64xf32> to vector<8xf32>
    %113 = vector.shape_cast %112 : vector<8xf32> to vector<8x1xf32>
    %c0_70 = arith.constant 0 : index
    %c0_71 = arith.constant 0 : index
    %114 = vector.load %arg11[%c0_70, %c0_71] : memref<1x1xf32, #tpu.memory_space<vmem>>, vector<1x1xf32>
    %115 = vector.broadcast %114 : vector<1x1xf32> to vector<8x1xf32>
    %116 = arith.addf %113, %115 : vector<8x1xf32>
    %117 = vector.shape_cast %116 : vector<8x1xf32> to vector<8x1xf32>
    %118 = vector.broadcast %117 : vector<8x1xf32> to vector<8x128xf32>
    %c0_72 = arith.constant 0 : index
    %c0_73 = arith.constant 0 : index
    %119 = vector.load %arg12[%c0_72, %c0_73] : memref<8x128xf32, #tpu.memory_space<vmem>>, vector<8x128xf32>
    tpu.vector_store %arg12[%c0_72, %c0_73], %118 {strides = array<i32>} : memref<8x128xf32, #tpu.memory_space<vmem>>, vector<8x128xf32>,
    return
  }
}

</mosaic_0001>

<bundles_post_ra>
// kernel: tpu_custom_call.1
= control target key start
LH: loop header
LB: loop body
LE: loop exit
PB: predicated region body
PF: predicated region fallthrough
CT: control target
= control target key end

     0   :  { %s1388_s0 = inlined_call_operand.vmem [shape: f32[8,16], index: 0, kind: input, shape index: {}]   ;;  %s1389_s1 = inlined_call_operand.vmem [shape: bf16[16,32], index: 1, kind: input, shape index: {}]   ;;  %s1390_s2 = inlined_call_operand.vmem [shape: f32[1,32], index: 2, kind: input, shape index: {}]   ;;  %s1391_s3 = inlined_call_operand.vmem [shape: bf16[4,32,32], index: 3, kind: input, shape index: {}]   ;;  %s1392_s4 = inlined_call_operand.hbm [shape: bf16[4,32,32], index: 4, kind: input, shape index: {}]   ;;  %s1393_s5 = inlined_call_operand.vmem [shape: f32[4,2,32], index: 5, kind: input, shape index: {}]   ;;  %s1394_s6 = inlined_call_operand.vmem [shape: bf16[32,128], index: 6, kind: input, shape index: {}]   ;;  %s1395_s7 = inlined_call_operand.vmem [shape: f32[1,128], index: 7, kind: input, shape index: {}]   ;;  %s1396_s8 = inlined_call_operand.vmem [shape: bf16[128,64], index: 8, kind: input, shape index: {}]   ;;  %s1397_s9 = inlined_call_operand.vmem [shape: f32[1,64], index: 9, kind: input, shape index: {}]   ;;  %s1398_s10 = inlined_call_operand.vmem [shape: f32[1,64], index: 10, kind: input, shape index: {}]   ;;  %s1399_s11 = inlined_call_operand.<no memory space> [shape: f32[1,1], index: 11, kind: input, shape index: {}]   ;;  %s1400_s12 = inlined_call_operand.hbm [shape: f32[8,128], index: 12, kind: output, shape index: {}]  }
   0x1   :  { %v17_v0 = vstv %s1399_s11 }
   0x2   :  { %18 = vst [vmem:[#allocation2] sm:$0x1] %v17_v0 }
   0x3   :  { %19 = vsyncpa [#allocation4], 0 }
   0x4   :  { %20 = vsyncpa [#allocation5], 0  ;;  %s1153_s23 = smov [#allocation3]  }
   0x5   :  { %s34_s24 = sshll.u32 %s1153_s23, 4  ;;  %s35_s24 = int_to_ptr.vmem [resolvable:$true] %s34_s24 }
   0x6   :  { %s1117_s25 = scalar_lea.vmem %s35_s24, 1024  ;;  %p1122_p1 = scmp.lt.s32.totalorder %s35_s24, %s35_s24 }
   0x7   :  { %p1118_p0 = scmp.ne.s32.totalorder %s35_s24, %s1117_s25  ;;  %p1123_p2 = scmp.lt.s32.totalorder %s1117_s25, %s1117_s25 }
   0x9   :  { %p1124_p3 = por %p1123_p2, %p1122_p1 }
   0xb   :  { %p1125_p4 = pnand %p1124_p3, %p1118_p0 }
   0xd   :  { %1128 = shalt.err (!%p1125_p4)
}
   0xe   :  { %s1154_s26 = smov 64   ;;  %s1155_s27 = smov 4  }
   0xf   :  { %40 = dma.hbm_to_vmem [thread:$0]  %s1392_s4, 1024, %s35_s24, [#allocation4], %s1154_s26, %s1154_s26, %s1155_s27  }
  0x10   :  { %1149 = dma.done.wait [#allocation4], 1024  }
  0x11   :  { %1150 = vsyncadd [#allocation4], 4294966272  ;;  %v1156_v1 = vmov 0.0   ;;  %vm1157_vm0 = vmmov 0   ;;  %v1082_v2 = vld [vmem:[%s1389_s1] sm:$0xff]   ;;  %vm76_vm1 = vcmask 130048   ;;  %v127_v17 = vlaneseq }
  0x12   :  { %976 = vmatprep.subr.bf16.mxu1 %v1156_v1  ;;  %978 = vmatprep.mubr.msk.bf16.mxu1 %vm1157_vm0, %v1156_v1  ;;  %v59_v3 = vld [vmem:[%s1388_s0] sm:$0xff]  ;;  %v1083_v5 = vld [vmem:[%s1391_s3 + $0x8] sm:$0xff]   ;;  %vm143_vm2 = vcmask 261120   ;;  %v1087_v29 = vld [vmem:[%s1391_s3 + $0x18] sm:$0xff]   ;;  %vm848_vm3 = vcmask 523264  }
  0x13   :  { %1006 = vmatprep.subr.bf16.mxu0 %v1156_v1  ;;  %1010 = vmatprep.mubr.msk.bf16.mxu0 %vm1157_vm0, %v1156_v1  ;;  %v60_v4 = vpack.c.bf16 %v59_v3, %v59_v3  ;;  %v1084_v6 = vld [vmem:[%s1391_s3] sm:$0xff]   ;;  %v1085_v13 = vld [vmem:[#allocation3 + $0x8] sm:$0xff]   ;;  %v128_v18 = vshrl.u32 %v127_v17, 7  ;;  %v1090_v42 = vld [vmem:[#allocation3 + $0x10] sm:$0xff]  }
  0x14   :  { %977 = vmatpush3.bf16.msra.mxu1 %v1082_v2  ;;  %v881_v7 = vld [vmem:[%s1390_s2] ss:$0 sm:$0xff]  ;;  %v1086_v16 = vld [vmem:[#allocation3] sm:$0xff]   ;;  %v1088_v30 = vld [vmem:[%s1391_s3 + $0x10] sm:$0xff]  }
  0x15   :  { %982 = vmatprep.subr.bf16.mxu1 %v1156_v1  ;;  %v1262_v19 = vsub.s32 0, %v128_v18  ;;  %v121_v20 = vld [vmem:[%s1393_s5] sm:$0x3]  ;;  %v1279_v31 = vsub.s32 1, %v128_v18  ;;  %v890_v43 = vld [vmem:[%s1393_s5 + $0x2] sm:$0x3] }
  0x16   :  { %v1089_v41 = vld [vmem:[#allocation3 + $0x18] sm:$0xff]   ;;  %v1091_v52 = vld [vmem:[%s1391_s3 + $0x28] sm:$0xff]   ;;  %v901_v2 = vld [vmem:[%s1393_s5 + $0x4] sm:$0x3] }
  0x17   :  { %979 = vmatmul.mubr.msk.bf16.vlgmr.msra.gmra.mxu1 %vm76_vm1, %v60_v4  ;;  %v130_v21 = vrot.slane %v121_v20, %v1262_v19  ;;  %v196_v32 = vrot.slane %v121_v20, %v1279_v31  ;;  %1007 = vmatpush3.bf16.msra.mxu0 %v1089_v41  ;;  %v265_v44 = vrot.slane %v890_v43, %v1262_v19  ;;  %v1092_v53 = vld [vmem:[%s1391_s3 + $0x20] sm:$0xff]   ;;  %v1093_v54 = vld [vmem:[#allocation3 + $0x28] sm:$0xff]  }
  0x18   :  { %983 = vmatpush3.bf16.msra.mxu1 %v1083_v5  ;;  %986 = vmatprep.mubr.msk.bf16.mxu1 %vm1157_vm0, %v1156_v1  ;;  %v331_v55 = vrot.slane %v890_v43, %v1279_v31  ;;  %v1094_v0 = vld [vmem:[#allocation3 + $0x20] sm:$0xff]   ;;  %v400_v3 = vrot.slane %v901_v2, %v1262_v19  ;;  %v1106_v41 = vld [vmem:[%s1396_s8 + $0x10] sm:$0xff]  }
  0x19   :  { %984 = vmatprep.subr.bf16.mxu1 %v1156_v1  ;;  %1008 = vmatprep.subr.bf16.mxu0 %v1156_v1 }
  0x1b   :  { %1009 = vmatpush3.bf16.msra.mxu0 %v1090_v42 }
  0x1c   :  { %985 = vmatpush3.bf16.msra.mxu1 %v1084_v6  ;;  %1022 = vmatprep.subr.bf16.mxu0 %v1156_v1 }
  0x1d   :  { %990 = vmatprep.subr.bf16.mxu1 %v1156_v1 }
  0xd7   :  { %v114_v8 = vpop.f32.mrf.mxu1 }
  0xd8   :  { %v115_v9 = vadd.f32 %v881_v7, %v114_v8 }
  0xd9   :  { %v980_v10 = vpop.f32.mrf.mxu1 }
  0xda   :  { %v120_v11 = vmax.f32 %v115_v9, 0.0 }
  0xdb   :  { %v117_v12 = vpop.f32.mrf.mxu1 }
  0xdc   :  { %v122_v14 = vpack.c.bf16 %v120_v11, %v120_v11  ;;  %v1096_v12 = vld [vmem:[%s1391_s3 + $0x30] sm:$0xff]  }
  0xdd   :  { %v981_v15 = vpop.f32.mrf.mxu1 }
  0xde   :  { %987 = vmatmul.mubr.msk.bf16.vlgmr.msra.gmra.mxu1 %vm143_vm2, %v122_v14  ;;  %v466_v14 = vrot.slane %v901_v2, %v1279_v31 }
  0xdf   :  { %991 = vmatpush3.bf16.msra.mxu1 %v1085_v13  ;;  %994 = vmatprep.mubr.msk.bf16.mxu1 %vm1157_vm0, %v1156_v1  ;;  %v1097_v13 = vld [vmem:[#allocation3 + $0x38] sm:$0xff]  }
  0xe0   :  { %992 = vmatprep.subr.bf16.mxu1 %v1156_v1 }
  0xe3   :  { %993 = vmatpush3.bf16.msra.mxu1 %v1086_v16 }
  0xe4   :  { %998 = vmatprep.subr.bf16.mxu1 %v1156_v1 }
 0x19e   :  { %v181_v22 = vpop.f32.mrf.mxu1 }
 0x19f   :  { %v182_v23 = vadd.f32 %v181_v22, %v130_v21 }
 0x1a0   :  { %v988_v24 = vpop.f32.mrf.mxu1 }
 0x1a1   :  { %v187_v25 = vmax.f32 %v182_v23, 0.0  ;;  %v1098_v24 = vld [vmem:[#allocation3 + $0x30] sm:$0xff]  }
 0x1a2   :  { %v184_v26 = vpop.f32.mrf.mxu1 }
 0x1a3   :  { %v188_v27 = vpack.c.bf16 %v187_v25, %v187_v25  ;;  %v912_v25 = vld [vmem:[%s1393_s5 + $0x6] sm:$0x3] }
 0x1a4   :  { %v989_v28 = vpop.f32.mrf.mxu1  ;;  %v535_v26 = vrot.slane %v912_v25, %v1262_v19  ;;  %v1100_v19 = vld [vmem:[%s1394_s6] sm:$0xff]   ;;  %v601_v42 = vrot.slane %v912_v25, %v1279_v31 }
 0x1a5   :  { %995 = vmatmul.mubr.msk.bf16.vlgmr.msra.gmra.mxu1 %vm143_vm2, %v188_v27  ;;  %v1108_v31 = vld [vmem:[%s1396_s8] sm:$0xff]  }
 0x1a6   :  { %1002 = vmatprep.mubr.msk.bf16.mxu1 %vm1157_vm0, %v1156_v1  ;;  %999 = vmatpush3.bf16.msra.mxu1 %v1087_v29 }
 0x1a7   :  { %1000 = vmatprep.subr.bf16.mxu1 %v1156_v1 }
 0x1aa   :  { %1001 = vmatpush3.bf16.msra.mxu1 %v1088_v30 }
 0x1ab   :  { %1014 = vmatprep.subr.bf16.mxu1 %v1156_v1 }
 0x265   :  { %v246_v33 = vpop.f32.mrf.mxu1 }
 0x266   :  { %v247_v34 = vadd.f32 %v246_v33, %v196_v32 }
 0x267   :  { %v996_v35 = vpop.f32.mrf.mxu1 }
 0x268   :  { %v252_v36 = vadd.f32 %v247_v34, %v120_v11  ;;  %v1095_v11 = vld [vmem:[%s1391_s3 + $0x38] sm:$0xff]   ;;  %v1099_v35 = vld [vmem:[%s1394_s6 + $0x8] sm:$0xff]  }
 0x269   :  { %v249_v37 = vpop.f32.mrf.mxu1 }
 0x26a   :  { %v253_v38 = vmax.f32 %v252_v36, 0.0  ;;  %v1101_v36 = vld [vmem:[%s1396_s8 + $0x38] sm:$0xff]   ;;  %v1102_v37 = vld [vmem:[%s1396_s8 + $0x30] sm:$0xff]  }
 0x26b   :  { %v997_v39 = vpop.f32.mrf.mxu1 }
 0x26c   :  { %v256_v40 = vpack.c.bf16 %v253_v38, %v253_v38  ;;  %v1104_v39 = vld [vmem:[%s1396_s8 + $0x20] sm:$0xff]  }
 0x26e   :  { %1003 = vmatmul.mubr.msk.bf16.vlgmr.msra.gmra.mxu1 %vm143_vm2, %v256_v40  ;;  %v1105_v40 = vld [vmem:[%s1396_s8 + $0x18] sm:$0xff]  }
 0x26f   :  { %1018 = vmatprep.mubr.msk.bf16.mxu1 %vm1157_vm0, %v1156_v1  ;;  %1015 = vmatpush3.bf16.msra.mxu1 %v1091_v52  ;;  %v923_v52 = vld [vmem:[%s1395_s7] ss:$0 sm:$0xff]  ;;  %s1159_s7 = smov [#allocation6]  }
 0x270   :  { %1016 = vmatprep.subr.bf16.mxu1 %v1156_v1 }
 0x273   :  { %1017 = vmatpush3.bf16.msra.mxu1 %v1092_v53 }
 0x274   :  { %1030 = vmatprep.subr.bf16.mxu1 %v1156_v1 }
 0x32e   :  { %v315_v45 = vpop.f32.mrf.mxu1 }
 0x32f   :  { %v316_v46 = vadd.f32 %v315_v45, %v265_v44 }
 0x330   :  { %v1004_v47 = vpop.f32.mrf.mxu1 }
 0x331   :  { %v321_v48 = vmax.f32 %v316_v46, 0.0 }
 0x332   :  { %v318_v49 = vpop.f32.mrf.mxu1 }
 0x333   :  { %v322_v50 = vpack.c.bf16 %v321_v48, %v321_v48 }
 0x334   :  { %v1005_v51 = vpop.f32.mrf.mxu1 }
 0x335   :  { %1011 = vmatmul.mubr.msk.bf16.vlgmr.msra.gmra.mxu0 %vm143_vm2, %v322_v50  ;;  %v1107_v51 = vld [vmem:[%s1396_s8 + $0x8] sm:$0xff]  }
 0x336   :  { %1026 = vmatprep.mubr.msk.bf16.mxu0 %vm1157_vm0, %v1156_v1  ;;  %1023 = vmatpush3.bf16.msra.mxu0 %v1093_v54 }
 0x337   :  { %1024 = vmatprep.subr.bf16.mxu0 %v1156_v1 }
 0x33a   :  { %1025 = vmatpush3.bf16.msra.mxu0 %v1094_v0 }
 0x33b   :  { %1038 = vmatprep.subr.bf16.mxu0 %v1156_v1 }
 0x3f5   :  { %v381_v56 = vpop.f32.mrf.mxu0 }
 0x3f6   :  { %v382_v57 = vadd.f32 %v381_v56, %v331_v55 }
 0x3f7   :  { %v1012_v58 = vpop.f32.mrf.mxu0 }
 0x3f8   :  { %v387_v59 = vadd.f32 %v382_v57, %v253_v38  ;;  %v1103_v38 = vld [vmem:[%s1396_s8 + $0x28] sm:$0xff]  }
 0x3f9   :  { %v384_v60 = vpop.f32.mrf.mxu0 }
 0x3fa   :  { %v388_v61 = vmax.f32 %v387_v59, 0.0 }
 0x3fb   :  { %v1013_v62 = vpop.f32.mrf.mxu0 }
 0x3fc   :  { %v391_v63 = vpack.c.bf16 %v388_v61, %v388_v61 }
 0x3fe   :  { %1019 = vmatmul.mubr.msk.bf16.vlgmr.msra.gmra.mxu1 %vm143_vm2, %v391_v63  ;;  %v936_v63 = vld [vmem:[%s1398_s10] ss:$0 sm:$0xff] }
 0x3ff   :  { %1034 = vmatprep.mubr.msk.bf16.mxu1 %vm1157_vm0, %v1156_v1  ;;  %1031 = vmatpush3.bf16.msra.mxu1 %v1095_v11 }
 0x400   :  { %1032 = vmatprep.subr.bf16.mxu1 %v1156_v1 }
 0x403   :  { %1033 = vmatpush3.bf16.msra.mxu1 %v1096_v12 }
 0x404   :  { %1046 = vmatprep.subr.bf16.mxu1 %v1156_v1 }
 0x4be   :  { %v450_v4 = vpop.f32.mrf.mxu1 }
 0x4bf   :  { %v451_v5 = vadd.f32 %v450_v4, %v400_v3 }
 0x4c0   :  { %v1020_v6 = vpop.f32.mrf.mxu1 }
 0x4c1   :  { %v456_v7 = vmax.f32 %v451_v5, 0.0  ;;  %v1158_v6 = vmov 0  }
 0x4c2   :  { %v453_v8 = vpop.f32.mrf.mxu1  ;;  %1081 = vset.pattern.permute.xlu0 %v1158_v6 }
 0x4c3   :  { %v457_v9 = vpack.c.bf16 %v456_v7, %v456_v7  ;;  %v937_v7 = vld [vmem:[#allocation2] ss:$0 sm:$0xff] }
 0x4c4   :  { %v1021_v10 = vpop.f32.mrf.mxu1 }
 0x4c5   :  { %1027 = vmatmul.mubr.msk.bf16.vlgmr.msra.gmra.mxu0 %vm143_vm2, %v457_v9 }
 0x4c6   :  { %1042 = vmatprep.mubr.msk.bf16.mxu0 %vm1157_vm0, %v1156_v1  ;;  %1039 = vmatpush3.bf16.msra.mxu0 %v1097_v13 }
 0x4c7   :  { %1040 = vmatprep.subr.bf16.mxu0 %v1156_v1 }
 0x4ca   :  { %1041 = vmatpush3.bf16.msra.mxu0 %v1098_v24 }
 0x4cb   :  { %1054 = vmatprep.subr.bf16.mxu0 %v1156_v1 }
 0x585   :  { %v516_v15 = vpop.f32.mrf.mxu0 }
 0x586   :  { %v517_v16 = vadd.f32 %v516_v15, %v466_v14 }
 0x587   :  { %v1028_v17 = vpop.f32.mrf.mxu0 }
 0x588   :  { %v522_v18 = vadd.f32 %v517_v16, %v388_v61 }
 0x589   :  { %v519_v20 = vpop.f32.mrf.mxu0 }
 0x58a   :  { %v523_v21 = vmax.f32 %v522_v18, 0.0 }
 0x58b   :  { %v1029_v22 = vpop.f32.mrf.mxu0 }
 0x58c   :  { %v526_v23 = vpack.c.bf16 %v523_v21, %v523_v21 }
 0x58e   :  { %1035 = vmatmul.mubr.msk.bf16.vlgmr.msra.gmra.mxu1 %vm143_vm2, %v526_v23 }
 0x58f   :  { %1050 = vmatprep.mubr.msk.bf16.mxu1 %vm1157_vm0, %v1156_v1  ;;  %1047 = vmatpush3.bf16.msra.mxu1 %v1099_v35 }
 0x590   :  { %1048 = vmatprep.subr.bf16.mxu1 %v1156_v1 }
 0x593   :  { %1049 = vmatpush3.bf16.msra.mxu1 %v1100_v19 }
 0x64e   :  { %v585_v27 = vpop.f32.mrf.mxu1 }
 0x64f   :  { %v586_v28 = vadd.f32 %v585_v27, %v535_v26 }
 0x650   :  { %v1036_v29 = vpop.f32.mrf.mxu1 }
 0x651   :  { %v591_v30 = vmax.f32 %v586_v28, 0.0 }
 0x652   :  { %v588_v32 = vpop.f32.mrf.mxu1 }
 0x653   :  { %v592_v33 = vpack.c.bf16 %v591_v30, %v591_v30 }
 0x654   :  { %v1037_v34 = vpop.f32.mrf.mxu1 }
 0x655   :  { %1043 = vmatmul.mubr.msk.bf16.vlgmr.msra.gmra.mxu0 %vm143_vm2, %v592_v33 }
 0x656   :  { %1070 = vmatprep.mubr.msk.bf16.mxu0 %vm1157_vm0, %v1156_v1  ;;  %1055 = vmatpush3.bf16.msra.mxu0 %v1101_v36 }
 0x657   :  { %1056 = vmatprep.subr.bf16.mxu0 %v1156_v1 }
 0x65a   :  { %1057 = vmatpush3.bf16.msra.mxu0 %v1102_v37 }
 0x65b   :  { %1058 = vmatprep.subr.bf16.mxu0 %v1156_v1 }
 0x65e   :  { %1059 = vmatpush3.bf16.msra.mxu0 %v1103_v38 }
 0x65f   :  { %1060 = vmatprep.subr.bf16.mxu0 %v1156_v1 }
 0x662   :  { %1061 = vmatpush3.bf16.msra.mxu0 %v1104_v39 }
 0x663   :  { %1062 = vmatprep.subr.bf16.mxu0 %v1156_v1 }
 0x666   :  { %1063 = vmatpush3.bf16.msra.mxu0 %v1105_v40 }
 0x667   :  { %1064 = vmatprep.subr.bf16.mxu0 %v1156_v1 }
 0x66a   :  { %1065 = vmatpush3.bf16.msra.mxu0 %v1106_v41 }
 0x66b   :  { %1066 = vmatprep.subr.bf16.mxu0 %v1156_v1 }
 0x66e   :  { %1067 = vmatpush3.bf16.msra.mxu0 %v1107_v51 }
 0x66f   :  { %1068 = vmatprep.subr.bf16.mxu0 %v1156_v1  ;;  %v927_v1 = vld [vmem:[%s1397_s9] ss:$0 sm:$0xff]  ;;  %s872_s9 = sshll.u32 %s1159_s7, 4  ;;  %s873_s9 = int_to_ptr.vmem [resolvable:$true] %s872_s9 }
 0x670   :  { %s1129_s15 = scalar_lea.vmem %s873_s9, 128  ;;  %p1134_p6 = scmp.lt.s32.totalorder %s873_s9, %s873_s9 }
 0x671   :  { %p1130_p5 = scmp.ne.s32.totalorder %s873_s9, %s1129_s15  ;;  %p1135_p7 = scmp.lt.s32.totalorder %s1129_s15, %s1129_s15 }
 0x672   :  { %1069 = vmatpush3.bf16.msra.mxu0 %v1108_v31 }
 0x673   :  { %p1136_p8 = por %p1135_p7, %p1134_p6 }
 0x675   :  { %p1137_p9 = pnand %p1136_p8, %p1130_p5 }
 0x715   :  { %v651_v43 = vpop.f32.mrf.mxu0 }
 0x716   :  { %v652_v44 = vadd.f32 %v651_v43, %v601_v42 }
 0x717   :  { %v1044_v45 = vpop.f32.mrf.mxu0 }
 0x718   :  { %v657_v46 = vadd.f32 %v652_v44, %v523_v21 }
 0x719   :  { %v654_v47 = vpop.f32.mrf.mxu0 }
 0x71a   :  { %v658_v48 = vmax.f32 %v657_v46, 0.0 }
 0x71b   :  { %v1045_v49 = vpop.f32.mrf.mxu0 }
 0x71c   :  { %v659_v50 = vpack.c.bf16 %v658_v48, %v658_v48 }
 0x71e   :  { %1051 = vmatmul.mubr.msk.bf16.vlgmr.msra.gmra.mxu1 %vm143_vm2, %v659_v50 }
 0x7de   :  { %v720_v53 = vpop.f32.mrf.mxu1 }
 0x7df   :  { %v721_v54 = vadd.f32 %v923_v52, %v720_v53 }
 0x7e0   :  { %v1052_v55 = vpop.f32.mrf.mxu1 }
 0x7e1   :  { %v726_v56 = vmax.f32 %v721_v54, 0.0 }
 0x7e2   :  { %v723_v57 = vpop.f32.mrf.mxu1 }
 0x7e3   :  { %v727_v58 = vpack.c.bf16 %v726_v56, %v726_v56 }
 0x7e4   :  { %v1053_v59 = vpop.f32.mrf.mxu1 }
 0x7e5   :  { %1071 = vmatmul.mubr.bf16.vlgmr.msra.gmra.mxu0 %v727_v58 }
 0x8a5   :  { %v833_v60 = vpop.f32.mrf.mxu0 }
 0x8a6   :  { %v834_v61 = vadd.f32 %v927_v1, %v833_v60 }
 0x8a7   :  { %v1072_v62 = vpop.f32.mrf.mxu0 }
 0x8a8   :  { %v839_v0 = vmax.f32 %v834_v61, 0.0 }
 0x8a9   :  { %v836_v2 = vpop.f32.mrf.mxu0 }
 0x8aa   :  { %v847_v3 = vmul.f32 %v936_v63, %v839_v0 }
 0x8ab   :  { %v1073_v4 = vpop.f32.mrf.mxu0 }
 0x8ac   :  { %v849_v5 = vsel %vm848_vm3, %v847_v3, 0.0 }
 0x8ad   :  { %850 = vadd.xlane.f32.xlu0 %v849_v5 }
 0x936   :  { %v851_v8 = vpop.xlane.xlu0 %850 }
 0x937   :  { %v859_v9 = vadd.f32 %v937_v7, %v851_v8 }
 0x939   :  { %862 = vperm.xlu0 %1081, %v859_v9  }
 0x9b4   :  { %v863_v10 = vpop.permute.xlu0 %862 }
 0x9b5   :  { %865 = vst [vmem:[#allocation6] sm:$0xff] %v863_v10 }
 0x9b6   :  { %1140 = shalt.err (!%p1137_p9)
}
 0x9b7   :  { %875 = dma.vmem_to_hbm [thread:$0]  %s873_s9, 128, %s1400_s12, [#allocation5]  }
 0x9b8   :  { %1151 = dma.done.wait [#allocation5], 128  }
 0x9b9   :  { %1152 = vsyncadd [#allocation5], 4294967168 }
 0x9ba   :  { %879 = vsyncpa [#allocation4], 1 }
 0x9bb   :  { %880 = vsyncpa [#allocation5], 1 }

</bundles_post_ra>
